<compile_context>
chip_gen: v6e
topology: v6e:2x2x1
jax: 0.10.0
libtpu: 0.0.40
codegen_flags: <defaults>
</compile_context>

<pallas_src>
import functools

import jax
import jax.numpy as jnp
import numpy as np
from jax.experimental import pallas as pl
from jax.experimental.pallas import tpu as pltpu

BN_EPS = 1e-5


# --------------------------------------------------------------------------- #
# Kernel
# --------------------------------------------------------------------------- #
def _deepfm_kernel(x_ref, wt_ref, out_ref, *, F, K, D):
    """One batch tile, batch on the lane axis.

    x_ref  : (D+1, tile_n)  rows 0..F-1  = first-order terms  e1*Xv
                            rows F..D-1  = second-order terms (e2*Xv) == deep input d
                            row  D       = ones (carries the fused bias)
    wt_ref : (K+2, D+1)     row 0   -> sum(first) + bias_total
                            rows 1..K -> S[k] = sum_f d[f,k]
                            row K+1 -> d @ w_eff   (collapsed deep stack)
    out_ref: (1, tile_n)
    """
    x = x_ref[...]                                                     # (D+1, tn)
    # Single fused MXU call: first-order sum, FM field sums, deep matvec, bias.
    r = jnp.dot(wt_ref[...], x, preferred_element_type=jnp.float32)   # (K+2, tn)

    d = x[F:D, :]                                                      # (F*K, tn)
    s = r[1:1 + K, :]                                                  # (K, tn)
    second = 0.5 * (jnp.sum(s * s, axis=0, keepdims=True)
                    - jnp.sum(d * d, axis=0, keepdims=True))           # (1, tn)

    out_ref[...] = r[0:1, :] + second + r[1 + K:2 + K, :]              # (1, tn)


# --------------------------------------------------------------------------- #
# Parameter preparation (done once per set of weights)
# --------------------------------------------------------------------------- #
def prepare_deepfm(params):
    """Concatenate embedding tables, fold eval-BN + both Linears into one affine,
    and build the fused (K+2, D+1) kernel weight."""
    F = len(params["emb1"])
    K = params["emb2"][0].shape[1]
    D = F * (K + 1)

    sizes = np.array([int(t.shape[0]) for t in params["emb1"]], dtype=np.int64)
    offsets = jnp.asarray(np.concatenate([[0], np.cumsum(sizes)[:-1]]),
                          dtype=jnp.int32)                              # (F,)
    emb1_tab = jnp.concatenate([t[:, 0] for t in params["emb1"]], axis=0)  # (sum_fs,)
    emb2_tab = jnp.concatenate(list(params["emb2"]), axis=0)               # (sum_fs, K)

    # ---- collapse Linear->BN(eval)->Linear->BN(eval); only sum(.,1) is used ----
    s1 = params["g1"] / jnp.sqrt(params["v1"] + BN_EPS)
    c1 = params["be1"] - params["m1"] * s1
    s2 = params["g2"] / jnp.sqrt(params["v2"] + BN_EPS)
    c2 = params["be2"] - params["m2"] * s2
    u = params["w2"] @ s2                                   # (h1,)
    w_eff = params["w1"] @ (s1 * u)                         # (F*K,)
    b_eff = (params["b1"] @ (s1 * u) + c1 @ u
             + params["b2"] @ s2 + jnp.sum(c2))             # scalar
    b_total = b_eff + params["bias"][0]

    # ---- fused weight (K+2, D+1) ----
    sel_t = jnp.tile(jnp.eye(K, dtype=jnp.float32), (1, F))             # (K, F*K)
    row0 = jnp.concatenate([jnp.ones((F,), jnp.float32),
                            jnp.zeros((F * K,), jnp.float32),
                            b_total[None].astype(jnp.float32)])         # (D+1,)
    rows_s = jnp.concatenate([jnp.zeros((K, F), jnp.float32), sel_t,
                              jnp.zeros((K, 1), jnp.float32)], axis=1)  # (K, D+1)
    row_d = jnp.concatenate([jnp.zeros((F,), jnp.float32),
                             w_eff.astype(jnp.float32),
                             jnp.zeros((1,), jnp.float32)])             # (D+1,)
    w_fused_t = jnp.concatenate([row0[None], rows_s, row_d[None]], axis=0)

    return dict(F=F, K=K, D=D, offsets=offsets,
                emb1_tab=emb1_tab, emb2_tab=emb2_tab,
                w_fused_t=w_fused_t.astype(jnp.float32))


# --------------------------------------------------------------------------- #
# Forward wrapper
# --------------------------------------------------------------------------- #
def deepfm_forward_pallas(Xi, Xv, prep, *, tile_n=512):
    """Xi: (N, F, 1) int32 indices, Xv: (N, F) float32 values -> (N,) scores."""
    F, K, D = prep["F"], prep["K"], prep["D"]
    N = Xi.shape[0]

    # --- consolidated embedding gathers: one take per table (JAX glue) ---
    idx = Xi[:, :, 0] + prep["offsets"][None, :]                 # (N, F)
    e1 = jnp.take(prep["emb1_tab"], idx, axis=0)                 # (N, F)
    e2 = jnp.take(prep["emb2_tab"], idx, axis=0)                 # (N, F, K)

    xv = Xv.astype(jnp.float32)
    first = e1 * xv                                              # (N, F)
    d = (e2 * xv[:, :, None]).reshape(N, F * K)                  # (N, F*K)

    # batch on lanes: [first ; d ; ones] -> (D+1, N), zero-pad lanes to tile
    x = jnp.concatenate([first.T, d.T, jnp.ones((1, N), jnp.float32)], axis=0)

    tile_n = int(min(tile_n, 128 * pl.cdiv(N, 128)))
    n_pad = int(tile_n * pl.cdiv(N, tile_n))
    x = jnp.pad(x, ((0, 0), (0, n_pad - N)))

    kernel = functools.partial(_deepfm_kernel, F=F, K=K, D=D)
    out = pl.pallas_call(
        kernel,
        out_shape=jax.ShapeDtypeStruct((1, n_pad), jnp.float32),
        grid=(n_pad // tile_n,),
        in_specs=[pl.BlockSpec((D + 1, tile_n), lambda i: (0, i)),     # streamed
                  pl.BlockSpec((K + 2, D + 1), lambda i: (0, 0))],     # resident
        out_specs=pl.BlockSpec((1, tile_n), lambda i: (0, i)),         # lane-dense
        compiler_params=pltpu.CompilerParams(
            dimension_semantics=("parallel",)),
    )(x, prep["w_fused_t"])
    return out[0, :N]                                            # (N,)


# --------------------------------------------------------------------------- #
# Pure-JAX reference (mirrors the PyTorch eval-mode forward)
# --------------------------------------------------------------------------- #
def deepfm_forward_ref(Xi, Xv, params):
    N, F, _ = Xi.shape
    K = params["emb2"][0].shape[1]
    e1 = jnp.stack([jnp.take(params["emb1"][i], Xi[:, i, 0], axis=0)[:, 0]
                    for i in range(F)], axis=1)
    first = e1 * Xv                                                      # (N, F)
    e2 = jnp.stack([jnp.take(params["emb2"][i], Xi[:, i, 0], axis=0)
                    for i in range(F)], axis=1)                          # (N, F, K)
    e2s = e2 * Xv[:, :, None]
    S = jnp.sum(e2s, axis=1)
    second = 0.5 * (S * S - jnp.sum(e2s * e2s, axis=1))                  # (N, K)
    d = e2s.reshape(N, F * K)
    h = d @ params["w1"] + params["b1"]
    h = (h - params["m1"]) / jnp.sqrt(params["v1"] + BN_EPS) * params["g1"] + params["be1"]
    h = h @ params["w2"] + params["b2"]
    h = (h - params["m2"]) / jnp.sqrt(params["v2"] + BN_EPS) * params["g2"] + params["be2"]
    return jnp.sum(first, 1) + jnp.sum(second, 1) + jnp.sum(h, 1) + params["bias"][0]


# --------------------------------------------------------------------------- #
# Param construction for the demo
# --------------------------------------------------------------------------- #
def make_params(key, feature_sizes, K, hidden_dims):
    F = len(feature_sizes)
    keys = jax.random.split(key, 16)
    emb1 = [jax.random.normal(jax.random.fold_in(keys[0], i), (fs, 1), jnp.float32) * 0.1
            for i, fs in enumerate(feature_sizes)]
    emb2 = [jax.random.normal(jax.random.fold_in(keys[1], i), (fs, K), jnp.float32) * 0.1
            for i, fs in enumerate(feature_sizes)]
    d_in, h1, h2 = F * K, hidden_dims[0], hidden_dims[1]
    return dict(
        emb1=emb1, emb2=emb2,
        w1=jax.random.normal(keys[2], (d_in, h1), jnp.float32) * 0.1,
        b1=jax.random.normal(keys[3], (h1,), jnp.float32) * 0.1,
        g1=1.0 + 0.1 * jax.random.normal(keys[4], (h1,), jnp.float32),
        be1=0.1 * jax.random.normal(keys[5], (h1,), jnp.float32),
        m1=0.1 * jax.random.normal(keys[6], (h1,), jnp.float32),
        v1=1.0 + 0.1 * jax.random.uniform(keys[7], (h1,), jnp.float32),
        w2=jax.random.normal(keys[8], (h1, h2), jnp.float32) * 0.1,
        b2=jax.random.normal(keys[9], (h2,), jnp.float32) * 0.1,
        g2=1.0 + 0.1 * jax.random.normal(keys[10], (h2,), jnp.float32),
        be2=0.1 * jax.random.normal(keys[11], (h2,), jnp.float32),
        m2=0.1 * jax.random.normal(keys[12], (h2,), jnp.float32),
        v2=1.0 + 0.1 * jax.random.uniform(keys[13], (h2,), jnp.float32),
        bias=jax.random.normal(keys[14], (1,), jnp.float32),
    )


if __name__ == "__main__":
    key = jax.random.PRNGKey(0)
    feature_sizes = [10, 20, 30, 40, 15, 25, 35, 45]   # field_size F = 8
    K = 4                                              # embedding_size
    hidden_dims = [32, 32]
    N = 8                                              # batch

    params = make_params(key, feature_sizes, K, hidden_dims)
    prep = prepare_deepfm(params)

    k_xi, k_xv = jax.random.split(jax.random.PRNGKey(0), 2)
    Xi = jnp.stack(
        [jax.random.randint(jax.random.fold_in(k_xi, i), (N, 1), 0, fs, jnp.int32)
         for i, fs in enumerate(feature_sizes)], axis=1)                 # (N, F, 1)
    Xv = jax.random.uniform(k_xv, (N, len(feature_sizes)), jnp.float32)  # (N, F)

    out = deepfm_forward_pallas(Xi, Xv, prep)
    out = jax.block_until_ready(out)

    ref = deepfm_forward_ref(Xi, Xv, params)
    np.testing.assert_allclose(np.asarray(out), np.asarray(ref), rtol=1e-4, atol=1e-4)
    print("KERNEL_OK")
</pallas_src>

<mosaic_0001>
module attributes {stable_mosaic.version = 11 : i64} {
  func.func @_deepfm_kernel(%arg0: i32, %arg1: memref<41x128xf32, #tpu.memory_space<vmem>>, %arg2: memref<6x41xf32, #tpu.memory_space<vmem>>, %arg3: memref<1x128xf32, #tpu.memory_space<vmem>>) attributes {dimension_semantics = [#tpu.dimension_semantics<parallel>], iteration_bounds = array<i64: 1>, scalar_prefetch = 0 : i64, scratch_operands = 0 : i64, tpu.core_type = #tpu.core_type<tc>, window_params = [{transform_indices = @transform_0, window_bounds = array<i64: 41, 128>}, {pipeline_mode = #tpu.pipeline_mode<synchronous>, transform_indices = @transform_1, window_bounds = array<i64: 6, 41>}, {transform_indices = @transform_2, window_bounds = array<i64: 1, 128>}]} {
    %c0 = arith.constant 0 : index
    %c0_0 = arith.constant 0 : index
    %0 = vector.load %arg1[%c0, %c0_0] : memref<41x128xf32, #tpu.memory_space<vmem>>, vector<41x128xf32>
    %c0_1 = arith.constant 0 : index
    %c0_2 = arith.constant 0 : index
    %1 = vector.load %arg2[%c0_1, %c0_2] : memref<6x41xf32, #tpu.memory_space<vmem>>, vector<6x41xf32>
    %cst = arith.constant dense<0.000000e+00> : vector<6x128xf32>
    %2 = tpu.matmul %1, %0, %cst {dimension_numbers = #tpu.dot_dimension_numbers<[1], [0], [0], [1], [0, 0, 1, 1], [], []>} : vector<6x41xf32>, vector<41x128xf32>, vector<6x128xf32> -> vector<6x128xf32>
    %3 = vector.extract_strided_slice %0 {offsets = [8, 0], sizes = [32, 128], strides = [1, 1]} : vector<41x128xf32> to vector<32x128xf32>
    %4 = vector.extract_strided_slice %2 {offsets = [1, 0], sizes = [4, 128], strides = [1, 1]} : vector<6x128xf32> to vector<4x128xf32>
    %5 = arith.mulf %4, %4 : vector<4x128xf32>
    %cst_3 = arith.constant dense<0.000000e+00> : vector<128xf32>
    %6 = vector.multi_reduction <add>, %5, %cst_3 [0] : vector<4x128xf32> to vector<128xf32>
    %7 = vector.shape_cast %6 : vector<128xf32> to vector<1x128xf32>
    %8 = arith.mulf %3, %3 : vector<32x128xf32>
    %cst_4 = arith.constant dense<0.000000e+00> : vector<128xf32>
    %9 = vector.multi_reduction <add>, %8, %cst_4 [0] : vector<32x128xf32> to vector<128xf32>
    %10 = vector.shape_cast %9 : vector<128xf32> to vector<1x128xf32>
    %11 = arith.subf %7, %10 : vector<1x128xf32>
    %cst_5 = arith.constant 5.000000e-01 : f32
    %12 = vector.broadcast %cst_5 : f32 to vector<1x128xf32>
    %13 = arith.mulf %12, %11 : vector<1x128xf32>
    %14 = vector.extract_strided_slice %2 {offsets = [0, 0], sizes = [1, 128], strides = [1, 1]} : vector<6x128xf32> to vector<1x128xf32>
    %15 = arith.addf %14, %13 : vector<1x128xf32>
    %16 = vector.extract_strided_slice %2 {offsets = [5, 0], sizes = [1, 128], strides = [1, 1]} : vector<6x128xf32> to vector<1x128xf32>
    %17 = arith.addf %15, %16 : vector<1x128xf32>
    %c0_6 = arith.constant 0 : index
    %c0_7 = arith.constant 0 : index
    %18 = vector.load %arg3[%c0_6, %c0_7] : memref<1x128xf32, #tpu.memory_space<vmem>>, vector<1x128xf32>
    tpu.vector_store %arg3[%c0_6, %c0_7], %17 {strides = array<i32>} : memref<1x128xf32, #tpu.memory_space<vmem>>, vector<1x128xf32>,
    return
  }
  func.func @transform_0(%arg0: i32) -> (i32, i32) {
    %c0_i32 = arith.constant 0 : i32
    %c0_i32_0 = arith.constant 0 : i32
    return %c0_i32, %arg0 : i32, i32
  }
  func.func @transform_1(%arg0: i32) -> (i32, i32) {
    %c0_i32 = arith.constant 0 : i32
    %c0_i32_0 = arith.constant 0 : i32
    %c0_i32_1 = arith.constant 0 : i32
    return %c0_i32, %c0_i32_0 : i32, i32
  }
  func.func @transform_2(%arg0: i32) -> (i32, i32) {
    %c0_i32 = arith.constant 0 : i32
    %c0_i32_0 = arith.constant 0 : i32
    return %c0_i32, %arg0 : i32, i32
  }
}

</mosaic_0001>

<bundles_post_ra>
// kernel: tpu_custom_call.1
= control target key start
LH: loop header
LB: loop body
LE: loop exit
PB: predicated region body
PF: predicated region fallthrough
CT: control target
= control target key end

     0   :  { %7 = vsyncpa [#allocation3], 0  ;;  %s300_s0 = inlined_call_operand.hbm [shape: f32[41,128], index: 0, kind: input, shape index: {}]   ;;  %s301_s1 = inlined_call_operand.hbm [shape: f32[6,41], index: 1, kind: input, shape index: {}]   ;;  %s302_s2 = inlined_call_operand.hbm [shape: f32[1,128], index: 2, kind: output, shape index: {}]  }
   0x1   :  { %8 = vsyncpa [#allocation6], 0 }
   0x2   :  { %9 = vsyncpa [#allocation4], 0  ;;  %s269_s9 = smov [#allocation2]  }
   0x3   :  { %s15_s10 = sshll.u32 %s269_s9, 4  ;;  %s16_s10 = int_to_ptr.vmem [resolvable:$true] %s15_s10 }
   0x4   :  { %s211_s11 = scalar_lea.vmem %s16_s10, 768  ;;  %p216_p1 = scmp.lt.s32.totalorder %s16_s10, %s16_s10 }
   0x5   :  { %p212_p0 = scmp.ne.s32.totalorder %s16_s10, %s211_s11  ;;  %p217_p2 = scmp.lt.s32.totalorder %s211_s11, %s211_s11 }
   0x7   :  { %p218_p3 = por %p217_p2, %p216_p1 }
   0x9   :  { %p219_p4 = pnand %p218_p3, %p212_p0 }
   0xb   :  { %222 = shalt.err (!%p219_p4)
}
   0xc   :  { %s270_s12 = smov 128   ;;  %s271_s13 = smov 8  }
   0xd   :  { %21 = dma.hbm_to_vmem [thread:$0]  %s300_s0, 768, %s16_s10, [#allocation3], %s270_s12, %s270_s12, %s271_s13  }
   0xe   :  { %s272_s16 = smov [#allocation5]  }
   0xf   :  { %s28_s17 = sshll.u32 %s272_s16, 4  ;;  %s29_s17 = int_to_ptr.vmem [resolvable:$true] %s28_s17 }
  0x10   :  { %s231_s18 = scalar_lea.vmem %s29_s17, 128  ;;  %p236_p6 = scmp.lt.s32.totalorder %s29_s17, %s29_s17 }
  0x11   :  { %p232_p5 = scmp.ne.s32.totalorder %s29_s17, %s231_s18  ;;  %p237_p7 = scmp.lt.s32.totalorder %s231_s18, %s231_s18 }
  0x13   :  { %p238_p8 = por %p237_p7, %p236_p6 }
  0x15   :  { %p239_p9 = pnand %p238_p8, %p232_p5 }
  0x17   :  { %242 = shalt.err (!%p239_p9)
}
  0x18   :  { %31 = dma.hbm_to_vmem [thread:$0]  %s301_s1, 128, %s29_s17, [#allocation6]  }
  0x19   :  { %263 = dma.done.wait [#allocation3], 768  }
  0x1a   :  { %264 = vsyncadd [#allocation3], 4294966528 }
  0x1b   :  { %265 = dma.done.wait [#allocation6], 128  }
  0x1c   :  { %266 = vsyncadd [#allocation6], 4294967168  ;;  %v273_v0 = vmov 0.0   ;;  %vm274_vm0 = vmmov 0   ;;  %vm49_vm1 = vcmask 1040384   ;;  %v42_v2 = vld [vmem:[#allocation2 + $0x20] sm:$0xff] }
  0x1d   :  { %181 = vmatprep.subr.mxu0 %v273_v0  ;;  %193 = vmatprep.mubr.msk.f32.mxu0 %vm274_vm0, %v273_v0  ;;  %v43_v1 = vld [vmem:[#allocation2 + $0x28] sm:$0x1]  ;;  %v41_v3 = vld [vmem:[#allocation2 + $0x18] sm:$0xff]  ;;  %v40_v4 = vld [vmem:[#allocation2 + $0x10] sm:$0xff]  ;;  %v138_v9 = vmul.f32 %v42_v2, %v42_v2  ;;  %vm45_vm2 = vcmask 334848   ;;  %vm127_vm3 = vcmask 1043456  }
  0x1e   :  { %182 = vmatpush3.msk.msra.mxu0 %vm49_vm1, %v43_v1  ;;  %v39_v5 = vld [vmem:[#allocation2 + $0x8] sm:$0xff]  ;;  %v137_v6 = vmul.f32 %v41_v3, %v41_v3  ;;  %v136_v7 = vmul.f32 %v40_v4, %v40_v4  ;;  %v38_v13 = vld [vmem:[#allocation2] sm:$0xff]  ;;  %v44_v14 = vld [vmem:[#allocation5] sm:$0x3f]  ;;  %s275_s0 = smov [#allocation7]  }
  0x1f   :  { %183 = vmatprep.subr.mxu0 %v273_v0  ;;  %v135_v8 = vmul.f32 %v39_v5, %v39_v5  ;;  %s162_s1 = sshll.u32 %s275_s0, 4  ;;  %s163_s1 = int_to_ptr.vmem [resolvable:$true] %s162_s1 }
  0x20   :  { %184 = vmatpush3.msra.mxu0 %v42_v2  ;;  %s243_s21 = scalar_lea.vmem %s163_s1, 16  ;;  %s247_s22 = scalar_lea.vmem %s163_s1, 32 }
  0x21   :  { %185 = vmatprep.subr.mxu0 %v273_v0  ;;  %v139_v10 = vadd.f32 %v136_v7, %v135_v8  ;;  %p244_p10 = scmp.ne.s32.totalorder %s163_s1, %s243_s21  ;;  %p248_p11 = scmp.lt.s32.totalorder %s163_s1, %s163_s1 }
  0x22   :  { %186 = vmatpush3.msra.mxu0 %v41_v3  ;;  %p249_p12 = scmp.lt.s32.totalorder %s247_s22, %s243_s21 }
  0x23   :  { %187 = vmatprep.subr.mxu0 %v273_v0  ;;  %v140_v11 = vadd.f32 %v139_v10, %v137_v6 }
  0x24   :  { %188 = vmatpush3.msra.mxu0 %v40_v4  ;;  %p250_p13 = por %p249_p12, %p248_p11 }
  0x25   :  { %189 = vmatprep.subr.mxu0 %v273_v0  ;;  %v141_v12 = vadd.f32 %v140_v11, %v138_v9 }
  0x26   :  { %190 = vmatpush3.msra.mxu0 %v39_v5  ;;  %p251_p0 = pnand %p250_p13, %p244_p10 }
  0x27   :  { %191 = vmatprep.subr.mxu0 %v273_v0  ;;  %v142_v15 = vrot.slane %v141_v12, 4 }
  0x28   :  { %192 = vmatpush3.msra.mxu0 %v38_v13 }
  0x29   :  { %194 = vmatmul.mubr.msk.f32.vlgmr.msra.gmra.mxu0 %vm45_vm2, %v44_v14  ;;  %v143_v16 = vadd.f32 %v142_v15, %v141_v12 }
  0x2b   :  { %v144_v19 = vrot.slane %v143_v16, 2 }
  0x2d   :  { %v145_v24 = vadd.f32 %v144_v19, %v143_v16 }
  0x2f   :  { %v146_v27 = vrot.slane %v145_v24, 1 }
  0x31   :  { %v147_v30 = vadd.f32 %v146_v27, %v145_v24 }
  0xe9   :  { %v119_v17 = vpop.f32.mrf.mxu0 }
  0xea   :  { %v123_v18 = vmul.f32 %v119_v17, %v119_v17  ;;  %v152_v35 = vrot.slane %v119_v17, 5 }
  0xeb   :  { %v195_v20 = vpop.f32.mrf.mxu0 }
  0xec   :  { %v125_v21 = vrot.slane %v123_v18, 1 }
  0xee   :  { %v128_v22 = vsel %vm127_vm3, %v125_v21, 0.0 }
  0xef   :  { %v129_v23 = vrot.slane %v128_v22, 4 }
  0xf1   :  { %v130_v25 = vadd.f32 %v129_v23, %v128_v22 }
  0xf3   :  { %v131_v26 = vrot.slane %v130_v25, 2 }
  0xf5   :  { %v132_v28 = vadd.f32 %v131_v26, %v130_v25 }
  0xf7   :  { %v133_v29 = vrot.slane %v132_v28, 1 }
  0xf9   :  { %v134_v31 = vadd.f32 %v133_v29, %v132_v28 }
  0xfb   :  { %v148_v32 = vsub.f32 %v134_v31, %v147_v30 }
  0xfd   :  { %v149_v33 = vmul.f32 0.5, %v148_v32 }
  0xff   :  { %v150_v34 = vadd.f32 %v149_v33, %v119_v17 }
 0x101   :  { %v154_v36 = vadd.f32 %v152_v35, %v150_v34 }
 0x103   :  { %155 = vst [vmem:[#allocation7] sm:$0x1] %v154_v36 }
 0x104   :  { %254 = shalt.err (!%p251_p0)
}
 0x105   :  { %165 = dma.vmem_to_hbm [thread:$0]  %s163_s1, 16, %s302_s2, [#allocation4]  }
 0x106   :  { %267 = dma.done.wait [#allocation4], 16  }
 0x107   :  { %268 = vsyncadd [#allocation4], 4294967280 }
 0x108   :  { %169 = vsyncpa [#allocation3], 1 }
 0x109   :  { %170 = vsyncpa [#allocation6], 1 }
 0x10a   :  { %171 = vsyncpa [#allocation4], 1 }

</bundles_post_ra>
